<compile_context>
chip_gen: v7x
topology: tpu7x:2x2x1
jax: 0.10.0
libtpu: 0.0.40
codegen_flags: <defaults>
</compile_context>

<pallas_src>
import functools

import jax
import jax.numpy as jnp
from jax.experimental import pallas as pl
from jax.experimental.pallas import tpu as pltpu


_INV_SQRT2 = 0.7071067811865476
_HAS_BUFFERED = hasattr(pl, "Buffered")


def _gelu_exact(h):
    # Exact (erf-based) GELU in f32 -- matches nn.GELU() default.
    # TODO(synk): if tanh-approx GELU is model-acceptable, it routes to the EUP
    # slot and frees VALU cycles once the MXU is fed at full rate.
    return 0.5 * h * (1.0 + jax.lax.erf(h * _INV_SQRT2))


def _ffn_resident_kernel(x_ref, w1_ref, b1_ref, w2_ref, b2_ref, o_ref):
    """Weights resident in VMEM; 1-D grid over row tiles."""
    x = x_ref[...].astype(w1_ref.dtype)          # in-kernel cast (bf16 path)
    h = jnp.dot(x, w1_ref[...], preferred_element_type=jnp.float32)
    h = _gelu_exact(h + b1_ref[...])
    # Dropout(p=0.0) is the identity (both dropouts in the reference module).
    # TODO(synk): for dropout > 0, draw a mask with pltpu.prng_seed /
    # pltpu.stateful_bernoulli and scale by 1/(1-p).
    out = jnp.dot(h.astype(w2_ref.dtype), w2_ref[...],
                  preferred_element_type=jnp.float32)
    o_ref[...] = (out + b2_ref[...]).astype(o_ref.dtype)


def _ffn_streaming_kernel(x_ref, w1_ref, b1_ref, w2_ref, b2_ref, o_ref, acc_ref):
    """Hidden axis tiled (grid axis 1, innermost); f32 VMEM accumulator."""
    k = pl.program_id(1)

    @pl.when(k == 0)
    def _init():
        # Fold b2 into the accumulator init (removes an epilogue VALU add).
        acc_ref[...] = jnp.broadcast_to(b2_ref[...], acc_ref.shape)

    x = x_ref[...].astype(w1_ref.dtype)
    h = jnp.dot(x, w1_ref[...], preferred_element_type=jnp.float32)
    h = _gelu_exact(h + b1_ref[...])
    acc_ref[...] += jnp.dot(h.astype(w2_ref.dtype), w2_ref[...],
                            preferred_element_type=jnp.float32)

    @pl.when(k == pl.num_programs(1) - 1)
    def _finalize():
        o_ref[...] = acc_ref[...].astype(o_ref.dtype)


def _round_up(x, m):
    return (x + m - 1) // m * m


def _vmem_limit_bytes():
    # Generation-aware: v7x has 64 MiB VMEM/TC, v5e/v6e have 128 MiB.
    try:
        cap = pltpu.get_tpu_info().vmem_capacity_bytes
    except Exception:
        cap = 64 * 1024 * 1024
    return int(min(cap * 3 // 4, 96 * 1024 * 1024))


@functools.partial(
    jax.jit,
    static_argnames=("tm", "th", "cdt_name", "resident", "single_buffer"))
def _ffn_impl(x, w1, b1, w2, b2, *, tm, th, cdt_name, resident, single_buffer):
    batch, seq, dim = x.shape
    hidden = w1.shape[1]
    M = batch * seq
    out_dtype = x.dtype
    cdt = jnp.bfloat16 if cdt_name == "bfloat16" else jnp.float32

    # No pad / no activation astype: x is streamed as-is, cast in-kernel,
    # ragged last row block is masked by Pallas.
    x2d = x.reshape(M, dim)
    w1c = w1.astype(cdt)
    w2c = w2.astype(cdt)
    b1_2d = b1.reshape(1, hidden).astype(jnp.float32)
    b2_2d = b2.reshape(1, dim).astype(jnp.float32)

    grid_m = pl.cdiv(M, tm)
    c_bytes = 2 if cdt == jnp.bfloat16 else 4
    x_bytes = x.dtype.itemsize
    o_bytes = jnp.dtype(out_dtype).itemsize

    if resident:
        # Weights DMA'd once, stay in VMEM across all row tiles.
        w_mode = ({"pipeline_mode": pl.Buffered(1)}
                  if (single_buffer and _HAS_BUFFERED) else {})
        grid = (grid_m,)
        in_specs = [
            pl.BlockSpec((tm, dim), lambda i: (i, 0)),                 # x rows
            pl.BlockSpec((dim, hidden), lambda i: (0, 0), **w_mode),   # W1
            pl.BlockSpec((1, hidden), lambda i: (0, 0)),               # b1
            pl.BlockSpec((hidden, dim), lambda i: (0, 0), **w_mode),   # W2
            pl.BlockSpec((1, dim), lambda i: (0, 0)),                  # b2
        ]
        out_specs = pl.BlockSpec((tm, dim), lambda i: (i, 0))
        scratch = []
        kernel = _ffn_resident_kernel
        dim_sem = ("parallel",)
        weight_passes = 1
    else:
        grid = (grid_m, hidden // th)
        in_specs = [
            pl.BlockSpec((tm, dim), lambda i, k: (i, 0)),   # x row tile
            pl.BlockSpec((dim, th), lambda i, k: (0, k)),   # W1 column tile
            pl.BlockSpec((1, th), lambda i, k: (0, k)),     # b1 tile
            pl.BlockSpec((th, dim), lambda i, k: (k, 0)),   # W2 row tile
            pl.BlockSpec((1, dim), lambda i, k: (0, 0)),    # b2 (resident)
        ]
        out_specs = pl.BlockSpec((tm, dim), lambda i, k: (i, 0))
        scratch = [pltpu.VMEM((tm, dim), jnp.float32)]
        kernel = _ffn_streaming_kernel
        dim_sem = ("parallel", "arbitrary")
        weight_passes = grid_m   # full W1+W2 re-streamed per row tile

    cost = pl.CostEstimate(
        flops=4 * M * dim * hidden,
        transcendentals=M * hidden,
        bytes_accessed=(x_bytes * M * dim + o_bytes * M * dim
                        + weight_passes * c_bytes * 2 * dim * hidden
                        + 4 * (hidden + dim)),
    )

    out2d = pl.pallas_call(
        kernel,
        out_shape=jax.ShapeDtypeStruct((M, dim), out_dtype),
        grid_spec=pltpu.PrefetchScalarGridSpec(
            num_scalar_prefetch=0,
            grid=grid,
            in_specs=in_specs,
            out_specs=out_specs,
            scratch_shapes=scratch,
        ),
        compiler_params=pltpu.CompilerParams(
            dimension_semantics=dim_sem,
            vmem_limit_bytes=_vmem_limit_bytes(),
        ),
        cost_estimate=cost,
    )(x2d, w1c, b1_2d, w2c, b2_2d)

    return out2d.reshape(batch, seq, dim)


def feed_forward(x, w1, b1, w2, b2, *, tm=None, th=None,
                 compute_dtype="bfloat16", weights_resident=None):
    """ViT FeedForward: Linear -> GELU(exact) -> Dropout(0) -> Linear -> Dropout(0).

    x: (batch, seq, dim); w1: (dim, hidden); b1: (hidden,); w2: (hidden, dim);
    b2: (dim,).  compute_dtype="bfloat16" (default) feeds the MXU bf16 inputs
    with f32 accumulation; "float32" keeps full precision matmuls.
    """
    batch, seq, dim = x.shape
    hidden = w1.shape[1]
    M = batch * seq

    cdt_name = ("float32" if compute_dtype in ("float32", jnp.float32)
                else "bfloat16")
    c_bytes = 2 if cdt_name == "bfloat16" else 4

    if weights_resident is None:
        # Resident if both weight matrices (compute dtype, single-buffered)
        # comfortably fit the generation's VMEM budget.
        budget = max(16 * 1024 * 1024, _vmem_limit_bytes() // 3)
        weights_resident = (th is None) and (2 * dim * hidden * c_bytes <= budget)

    if tm is None:
        # Resident: tm bounds x/out/acc tiles only.  Streaming: big tm so
        # FLOPs-per-weight-byte clears the HBM roofline crossover.
        tm = min(512 if weights_resident else 1024, _round_up(M, 8))
    if weights_resident:
        th = hidden
    elif th is None:
        th = hidden
        for cand in (512, 256, 128):   # prefer multiples of 256 (2x256^2 MXU)
            if hidden % cand == 0:
                th = cand
                break
    assert hidden % th == 0, "th must divide hidden_dim"

    kwargs = dict(tm=int(tm), th=int(th), cdt_name=cdt_name,
                  resident=bool(weights_resident))
    try:
        return _ffn_impl(x, w1, b1, w2, b2, single_buffer=True, **kwargs)
    except Exception:
        # Fallback for environments where pl.Buffered(1) is unsupported.
        return _ffn_impl(x, w1, b1, w2, b2, single_buffer=False, **kwargs)


def _reference(x, w1, b1, w2, b2):
    hp = jax.lax.Precision.HIGHEST
    h = jnp.einsum("bsd,dh->bsh", x, w1, precision=hp) + b1
    h = jax.nn.gelu(h, approximate=False)
    return jnp.einsum("bsh,hd->bsd", h, w2, precision=hp) + b2


if __name__ == "__main__":
    # 1) Small, module-consistent shapes; resident-weight path.
    batch, seq, dim, hidden = 2, 8, 32, 64

    key = jax.random.PRNGKey(0)
    kx, kw1, kb1, kw2, kb2 = jax.random.split(key, 5)

    x = jax.random.normal(kx, (batch, seq, dim), dtype=jnp.float32)
    # Deterministic "Linear" parameters (synthetic init, not a checkpoint).
    w1 = jax.random.normal(kw1, (dim, hidden), dtype=jnp.float32) * 0.05
    b1 = jax.random.normal(kb1, (hidden,), dtype=jnp.float32) * 0.05
    w2 = jax.random.normal(kw2, (hidden, dim), dtype=jnp.float32) * 0.05
    b2 = jax.random.normal(kb2, (dim,), dtype=jnp.float32) * 0.05

    ref = _reference(x, w1, b1, w2, b2)

    # f32 compute: exact parity with the reference.
    out_f32 = jax.block_until_ready(
        feed_forward(x, w1, b1, w2, b2, compute_dtype="float32"))
    assert out_f32.shape == (batch, seq, dim)
    assert jnp.allclose(out_f32, ref, atol=1e-5, rtol=1e-5), "f32 mismatch"

    # Default bf16-MXU path (f32 accumulation): looser tolerance.
    out_bf = jax.block_until_ready(feed_forward(x, w1, b1, w2, b2))
    assert jnp.allclose(out_bf, ref, atol=5e-2, rtol=5e-2), "bf16 mismatch"

    # 2) Ragged last row block (M=200 not divisible by tm) + resident weights.
    b2_, s2_, d2_, h2_ = 2, 100, 128, 256
    k2 = jax.random.PRNGKey(1)
    k2x, k2w1, k2b1, k2w2, k2b2 = jax.random.split(k2, 5)
    x_t = jax.random.normal(k2x, (b2_, s2_, d2_), dtype=jnp.float32)
    w1_t = jax.random.normal(k2w1, (d2_, h2_), dtype=jnp.float32) * 0.05
    b1_t = jax.random.normal(k2b1, (h2_,), dtype=jnp.float32) * 0.05
    w2_t = jax.random.normal(k2w2, (h2_, d2_), dtype=jnp.float32) * 0.05
    b2_t = jax.random.normal(k2b2, (d2_,), dtype=jnp.float32) * 0.05
    ref_t = _reference(x_t, w1_t, b1_t, w2_t, b2_t)

    out_r = jax.block_until_ready(
        feed_forward(x_t, w1_t, b1_t, w2_t, b2_t, tm=64,
                     compute_dtype="float32"))
    assert out_r.shape == (b2_, s2_, d2_)
    assert jnp.allclose(out_r, ref_t, atol=1e-4, rtol=1e-4), "ragged mismatch"

    # 3) Streaming path (hidden tiled, k-accumulation in the VMEM scratch),
    #    f32 and bf16.
    out_s = jax.block_until_ready(
        feed_forward(x_t, w1_t, b1_t, w2_t, b2_t, tm=64, th=128,
                     compute_dtype="float32", weights_resident=False))
    assert jnp.allclose(out_s, ref_t, atol=1e-4, rtol=1e-4), "streamed mismatch"

    out_sb = jax.block_until_ready(
        feed_forward(x_t, w1_t, b1_t, w2_t, b2_t, tm=64, th=128,
                     weights_resident=False))
    assert jnp.allclose(out_sb, ref_t, atol=5e-2, rtol=5e-2), "streamed bf16 mismatch"

    print("KERNEL_OK")
</pallas_src>

<mosaic_0001>
module attributes {stable_mosaic.version = 11 : i64} {
  func.func @_ffn_resident_kernel(%arg0: i32, %arg1: memref<16x32xf32, #tpu.memory_space<vmem>>, %arg2: memref<32x64xf32, #tpu.memory_space<vmem>>, %arg3: memref<1x64xf32, #tpu.memory_space<vmem>>, %arg4: memref<64x32xf32, #tpu.memory_space<vmem>>, %arg5: memref<1x32xf32, #tpu.memory_space<vmem>>, %arg6: memref<16x32xf32, #tpu.memory_space<vmem>>) attributes {dimension_semantics = [#tpu.dimension_semantics<parallel>], iteration_bounds = array<i64: 1>, scalar_prefetch = 0 : i64, scratch_operands = 0 : i64, tpu.core_type = #tpu.core_type<tc>, window_params = [{transform_indices = @transform_0, window_bounds = array<i64: 16, 32>}, {pipeline_mode = #tpu.pipeline_mode<synchronous>, transform_indices = @transform_1, window_bounds = array<i64: 32, 64>}, {pipeline_mode = #tpu.pipeline_mode<synchronous>, transform_indices = @transform_2, window_bounds = array<i64: 1, 64>}, {pipeline_mode = #tpu.pipeline_mode<synchronous>, transform_indices = @transform_3, window_bounds = array<i64: 64, 32>}, {pipeline_mode = #tpu.pipeline_mode<synchronous>, transform_indices = @transform_4, window_bounds = array<i64: 1, 32>}, {transform_indices = @transform_5, window_bounds = array<i64: 16, 32>}]} {
    %c0 = arith.constant 0 : index
    %c0_0 = arith.constant 0 : index
    %0 = vector.load %arg1[%c0, %c0_0] : memref<16x32xf32, #tpu.memory_space<vmem>>, vector<16x32xf32>
    %c0_1 = arith.constant 0 : index
    %c0_2 = arith.constant 0 : index
    %1 = vector.load %arg2[%c0_1, %c0_2] : memref<32x64xf32, #tpu.memory_space<vmem>>, vector<32x64xf32>
    %cst = arith.constant dense<0.000000e+00> : vector<16x64xf32>
    %2 = tpu.matmul %0, %1, %cst {dimension_numbers = #tpu.dot_dimension_numbers<[1], [0], [0], [1], [0, 0, 1, 1], [], []>} : vector<16x32xf32>, vector<32x64xf32>, vector<16x64xf32> -> vector<16x64xf32>
    %c0_3 = arith.constant 0 : index
    %c0_4 = arith.constant 0 : index
    %3 = vector.load %arg3[%c0_3, %c0_4] : memref<1x64xf32, #tpu.memory_space<vmem>>, vector<1x64xf32>
    %4 = vector.broadcast %3 : vector<1x64xf32> to vector<16x64xf32>
    %5 = arith.addf %2, %4 : vector<16x64xf32>
    %cst_5 = arith.constant 5.000000e-01 : f32
    %6 = vector.broadcast %cst_5 : f32 to vector<16x64xf32>
    %7 = arith.mulf %6, %5 : vector<16x64xf32>
    %cst_6 = arith.constant 0.707106769 : f32
    %8 = vector.broadcast %cst_6 : f32 to vector<16x64xf32>
    %9 = arith.mulf %5, %8 : vector<16x64xf32>
    %10 = math.erf %9 : vector<16x64xf32>
    %cst_7 = arith.constant 1.000000e+00 : f32
    %11 = vector.broadcast %cst_7 : f32 to vector<16x64xf32>
    %12 = arith.addf %11, %10 : vector<16x64xf32>
    %13 = arith.mulf %7, %12 : vector<16x64xf32>
    %c0_8 = arith.constant 0 : index
    %c0_9 = arith.constant 0 : index
    %14 = vector.load %arg4[%c0_8, %c0_9] : memref<64x32xf32, #tpu.memory_space<vmem>>, vector<64x32xf32>
    %cst_10 = arith.constant dense<0.000000e+00> : vector<16x32xf32>
    %15 = tpu.matmul %13, %14, %cst_10 {dimension_numbers = #tpu.dot_dimension_numbers<[1], [0], [0], [1], [0, 0, 1, 1], [], []>} : vector<16x64xf32>, vector<64x32xf32>, vector<16x32xf32> -> vector<16x32xf32>
    %c0_11 = arith.constant 0 : index
    %c0_12 = arith.constant 0 : index
    %16 = vector.load %arg5[%c0_11, %c0_12] : memref<1x32xf32, #tpu.memory_space<vmem>>, vector<1x32xf32>
    %17 = vector.broadcast %16 : vector<1x32xf32> to vector<16x32xf32>
    %18 = arith.addf %15, %17 : vector<16x32xf32>
    %c0_13 = arith.constant 0 : index
    %c0_14 = arith.constant 0 : index
    %19 = vector.load %arg6[%c0_13, %c0_14] : memref<16x32xf32, #tpu.memory_space<vmem>>, vector<16x32xf32>
    tpu.vector_store %arg6[%c0_13, %c0_14], %18 {strides = array<i32>} : memref<16x32xf32, #tpu.memory_space<vmem>>, vector<16x32xf32>,
    return
  }
  func.func @transform_0(%arg0: i32) -> (i32, i32) {
    %c0_i32 = arith.constant 0 : i32
    %c0_i32_0 = arith.constant 0 : i32
    return %arg0, %c0_i32 : i32, i32
  }
  func.func @transform_1(%arg0: i32) -> (i32, i32) {
    %c0_i32 = arith.constant 0 : i32
    %c0_i32_0 = arith.constant 0 : i32
    %c0_i32_1 = arith.constant 0 : i32
    return %c0_i32, %c0_i32_0 : i32, i32
  }
  func.func @transform_2(%arg0: i32) -> (i32, i32) {
    %c0_i32 = arith.constant 0 : i32
    %c0_i32_0 = arith.constant 0 : i32
    %c0_i32_1 = arith.constant 0 : i32
    return %c0_i32, %c0_i32_0 : i32, i32
  }
  func.func @transform_3(%arg0: i32) -> (i32, i32) {
    %c0_i32 = arith.constant 0 : i32
    %c0_i32_0 = arith.constant 0 : i32
    %c0_i32_1 = arith.constant 0 : i32
    return %c0_i32, %c0_i32_0 : i32, i32
  }
  func.func @transform_4(%arg0: i32) -> (i32, i32) {
    %c0_i32 = arith.constant 0 : i32
    %c0_i32_0 = arith.constant 0 : i32
    %c0_i32_1 = arith.constant 0 : i32
    return %c0_i32, %c0_i32_0 : i32, i32
  }
  func.func @transform_5(%arg0: i32) -> (i32, i32) {
    %c0_i32 = arith.constant 0 : i32
    %c0_i32_0 = arith.constant 0 : i32
    return %arg0, %c0_i32 : i32, i32
  }
}

module attributes {stable_mosaic.version = 11 : i64} {
  func.func @_ffn_resident_kernel(%arg0: i32, %arg1: memref<16x32xf32, #tpu.memory_space<vmem>>, %arg2: memref<32x64xf32, #tpu.memory_space<vmem>>, %arg3: memref<1x64xf32, #tpu.memory_space<vmem>>, %arg4: memref<64x32xf32, #tpu.memory_space<vmem>>, %arg5: memref<1x32xf32, #tpu.memory_space<vmem>>, %arg6: memref<16x32xf32, #tpu.memory_space<vmem>>) attributes {dimension_semantics = [#tpu.dimension_semantics<parallel>], iteration_bounds = array<i64: 1>, scalar_prefetch = 0 : i64, scratch_operands = 0 : i64, tpu.core_type = #tpu.core_type<tc>, window_params = [{transform_indices = @transform_0, window_bounds = array<i64: 16, 32>}, {pipeline_mode = #tpu.pipeline_mode<synchronous>, transform_indices = @transform_1, window_bounds = array<i64: 32, 64>}, {pipeline_mode = #tpu.pipeline_mode<synchronous>, transform_indices = @transform_2, window_bounds = array<i64: 1, 64>}, {pipeline_mode = #tpu.pipeline_mode<synchronous>, transform_indices = @transform_3, window_bounds = array<i64: 64, 32>}, {pipeline_mode = #tpu.pipeline_mode<synchronous>, transform_indices = @transform_4, window_bounds = array<i64: 1, 32>}, {transform_indices = @transform_5, window_bounds = array<i64: 16, 32>}]} {
    %c0 = arith.constant 0 : index
    %c0_0 = arith.constant 0 : index
    %0 = vector.load %arg1[%c0, %c0_0] : memref<16x32xf32, #tpu.memory_space<vmem>>, vector<16x32xf32>
    %c0_1 = arith.constant 0 : index
    %c0_2 = arith.constant 0 : index
    %1 = vector.load %arg2[%c0_1, %c0_2] : memref<32x64xf32, #tpu.memory_space<vmem>>, vector<32x64xf32>
    %cst = arith.constant dense<0.000000e+00> : vector<16x64xf32>
    %2 = tpu.matmul %0, %1, %cst {dimension_numbers = #tpu.dot_dimension_numbers<[1], [0], [0], [1], [0, 0, 1, 1], [], []>} : vector<16x32xf32>, vector<32x64xf32>, vector<16x64xf32> -> vector<16x64xf32>
    %c0_3 = arith.constant 0 : index
    %c0_4 = arith.constant 0 : index
    %3 = vector.load %arg3[%c0_3, %c0_4] : memref<1x64xf32, #tpu.memory_space<vmem>>, vector<1x64xf32>
    %4 = vector.broadcast %3 : vector<1x64xf32> to vector<16x64xf32>
    %5 = arith.addf %2, %4 : vector<16x64xf32>
    %cst_5 = arith.constant 5.000000e-01 : f32
    %6 = vector.broadcast %cst_5 : f32 to vector<16x64xf32>
    %7 = arith.mulf %6, %5 : vector<16x64xf32>
    %cst_6 = arith.constant 0.707106769 : f32
    %8 = vector.broadcast %cst_6 : f32 to vector<16x64xf32>
    %9 = arith.mulf %5, %8 : vector<16x64xf32>
    %10 = math.erf %9 : vector<16x64xf32>
    %cst_7 = arith.constant 1.000000e+00 : f32
    %11 = vector.broadcast %cst_7 : f32 to vector<16x64xf32>
    %12 = arith.addf %11, %10 : vector<16x64xf32>
    %13 = arith.mulf %7, %12 : vector<16x64xf32>
    %c0_8 = arith.constant 0 : index
    %c0_9 = arith.constant 0 : index
    %14 = vector.load %arg4[%c0_8, %c0_9] : memref<64x32xf32, #tpu.memory_space<vmem>>, vector<64x32xf32>
    %cst_10 = arith.constant dense<0.000000e+00> : vector<16x32xf32>
    %15 = tpu.matmul %13, %14, %cst_10 {dimension_numbers = #tpu.dot_dimension_numbers<[1], [0], [0], [1], [0, 0, 1, 1], [], []>} : vector<16x64xf32>, vector<64x32xf32>, vector<16x32xf32> -> vector<16x32xf32>
    %c0_11 = arith.constant 0 : index
    %c0_12 = arith.constant 0 : index
    %16 = vector.load %arg5[%c0_11, %c0_12] : memref<1x32xf32, #tpu.memory_space<vmem>>, vector<1x32xf32>
    %17 = vector.broadcast %16 : vector<1x32xf32> to vector<16x32xf32>
    %18 = arith.addf %15, %17 : vector<16x32xf32>
    %c0_13 = arith.constant 0 : index
    %c0_14 = arith.constant 0 : index
    %19 = vector.load %arg6[%c0_13, %c0_14] : memref<16x32xf32, #tpu.memory_space<vmem>>, vector<16x32xf32>
    tpu.vector_store %arg6[%c0_13, %c0_14], %18 {strides = array<i32>} : memref<16x32xf32, #tpu.memory_space<vmem>>, vector<16x32xf32>,
    return
  }
  func.func @transform_0(%arg0: i32) -> (i32, i32) {
    %c0_i32 = arith.constant 0 : i32
    %c0_i32_0 = arith.constant 0 : i32
    return %arg0, %c0_i32 : i32, i32
  }
  func.func @transform_1(%arg0: i32) -> (i32, i32) {
    %c0_i32 = arith.constant 0 : i32
    %c0_i32_0 = arith.constant 0 : i32
    %c0_i32_1 = arith.constant 0 : i32
    return %c0_i32, %c0_i32_0 : i32, i32
  }
  func.func @transform_2(%arg0: i32) -> (i32, i32) {
    %c0_i32 = arith.constant 0 : i32
    %c0_i32_0 = arith.constant 0 : i32
    %c0_i32_1 = arith.constant 0 : i32
    return %c0_i32, %c0_i32_0 : i32, i32
  }
  func.func @transform_3(%arg0: i32) -> (i32, i32) {
    %c0_i32 = arith.constant 0 : i32
    %c0_i32_0 = arith.constant 0 : i32
    %c0_i32_1 = arith.constant 0 : i32
    return %c0_i32, %c0_i32_0 : i32, i32
  }
  func.func @transform_4(%arg0: i32) -> (i32, i32) {
    %c0_i32 = arith.constant 0 : i32
    %c0_i32_0 = arith.constant 0 : i32
    %c0_i32_1 = arith.constant 0 : i32
    return %c0_i32, %c0_i32_0 : i32, i32
  }
  func.func @transform_5(%arg0: i32) -> (i32, i32) {
    %c0_i32 = arith.constant 0 : i32
    %c0_i32_0 = arith.constant 0 : i32
    return %arg0, %c0_i32 : i32, i32
  }
}

</mosaic_0001>

<bundles_post_ra>
// kernel: _ffn_impl.1
= control target key start
LH: loop header
LB: loop body
LE: loop exit
PB: predicated region body
PF: predicated region fallthrough
CT: control target
= control target key end

     0   :  { %vm34_vm0 = vcmask 261120   ;;  %s445_s0 = inlined_call_operand.vmem [shape: f32[16,32], index: 0, kind: input, shape index: {}]   ;;  %s446_s1 = inlined_call_operand.vmem [shape: f32[32,64], index: 1, kind: input, shape index: {}]   ;;  %s447_s2 = inlined_call_operand.vmem [shape: f32[1,64], index: 2, kind: input, shape index: {}]   ;;  %s448_s3 = inlined_call_operand.vmem [shape: f32[64,32], index: 3, kind: input, shape index: {}]   ;;  %s449_s4 = inlined_call_operand.vmem [shape: f32[1,32], index: 4, kind: input, shape index: {}]   ;;  %s450_s5 = inlined_call_operand.hbm [shape: f32[16,32], index: 5, kind: output, shape index: {}]  }
   0x1   :  { %v23_v0 = vld [vmem:[%s446_s1] sm:$0xff]  ;;  %v24_v1 = vld [vmem:[%s446_s1 + $0x8] sm:$0xff]  ;;  %v25_v2 = vld [vmem:[%s446_s1 + $0x10] sm:$0xff] }
   0x2   :  { %v293_v3 = vpack.c.bf16 %v24_v1, %v23_v0  ;;  %v26_v4 = vld [vmem:[%s446_s1 + $0x18] sm:$0xff]  ;;  %v21_v5 = vld [vmem:[%s445_s0] sm:$0xff] }
   0x3   :  { %v297_v6 = vpack.c.bf16 %v26_v4, %v25_v2  ;;  %271 = vmatprep.mubr.msk.f32.mxu0 %vm34_vm0, %v21_v5 }
   0x4   :  { %10 = vsyncpa [#allocation3], 0  ;;  %294 = vmatprep.subr.bf16.mxu0 %v293_v3  ;;  %v22_v7 = vld [vmem:[%s445_s0 + $0x8] sm:$0xff]  ;;  %v126_v8 = vld [vmem:[%s448_s3] sm:$0xff]  ;;  %vm141_vm1 = vcmask 523264   ;;  %s348_s21 = smov [#allocation2]  }
   0x5   :  { %296 = vmatpush3.bf16.msra.mxu0 %v293_v3  ;;  %v127_v9 = vld [vmem:[%s448_s3 + $0x8] sm:$0xff]  ;;  %v128_v11 = vld [vmem:[%s448_s3 + $0x10] sm:$0xff]  ;;  %v129_v12 = vld [vmem:[%s448_s3 + $0x18] sm:$0xff]  ;;  %s230_s22 = sshll.u32 %s348_s21, 4  ;;  %s231_s22 = int_to_ptr.vmem [resolvable:$true] %s230_s22 }
   0x6   :  { %298 = vmatprep.subr.bf16.mxu0 %v297_v6  ;;  %v301_v10 = vpack.c.bf16 %v127_v9, %v126_v8  ;;  %v305_v13 = vpack.c.bf16 %v129_v12, %v128_v11  ;;  %v130_v14 = vld [vmem:[%s448_s3 + $0x20] sm:$0xff]  ;;  %v131_v15 = vld [vmem:[%s448_s3 + $0x28] sm:$0xff]  ;;  %v132_v17 = vld [vmem:[%s448_s3 + $0x30] sm:$0xff]  ;;  %s324_s23 = scalar_lea.vmem %s231_s22, 256  ;;  %p329_p1 = scmp.lt.s32.totalorder %s231_s22, %s231_s22 }
   0x7   :  { %v309_v16 = vpack.c.bf16 %v131_v15, %v130_v14  ;;  %v133_v18 = vld [vmem:[%s448_s3 + $0x38] sm:$0xff]  ;;  %v241_v20 = vld [vmem:[%s447_s2] ss:$0 sm:$0xff]  ;;  %p325_p0 = scmp.ne.s32.totalorder %s231_s22, %s324_s23  ;;  %p330_p2 = scmp.lt.s32.totalorder %s324_s23, %s324_s23 }
   0x8   :  { %302 = vmatprep.subr.bf16.mxu1 %v301_v10  ;;  %v313_v19 = vpack.c.bf16 %v133_v18, %v132_v17  ;;  %v244_v35 = vld [vmem:[%s449_s4] ss:$0 sm:$0xff] }
   0x9   :  { %300 = vmatpush3.bf16.msra.mxu0 %v297_v6  ;;  %304 = vmatpush3.bf16.msra.mxu1 %v301_v10  ;;  %p331_p3 = por %p330_p2, %p329_p1 }
   0xa   :  { %306 = vmatprep.subr.bf16.mxu1 %v305_v13 }
   0xb   :  { %p332_p4 = pnand %p331_p3, %p325_p0 }
   0xc   :  { %272 = vmatmul.mubr.msk.f32.vlgmr.msra.gmra.mrb[0].mxu0 %vm34_vm0, %v22_v7 }
   0xd   :  { %308 = vmatpush3.bf16.msra.mxu1 %v305_v13 }
   0xe   :  { %310 = vmatprep.subr.bf16.mxu1 %v309_v16 }
  0x11   :  { %312 = vmatpush3.bf16.msra.mxu1 %v309_v16 }
  0x12   :  { %314 = vmatprep.subr.bf16.mxu1 %v313_v19 }
  0x15   :  { %316 = vmatpush3.bf16.msra.mxu1 %v313_v19 }
  0xdf   :  { %v273_v21 = vpop.f32.mrb[0].mxu0 }
  0xe0   :  { %v113_v22 = vadd.f32 %v273_v21, %v241_v20  ;;  %v107_v23 = vpop.f32.mrb[1].mxu0 }
  0xe1   :  { %v108_v24 = vadd.f32 %v241_v20, %v107_v23 }
  0xe2   :  { %v119_v25 = vmul.f32 0.70710677, %v113_v22  ;;  %v117_v32 = vmul.f32 0.5, %v113_v22 }
  0xe3   :  { %v118_v26 = vmul.f32 0.70710677, %v108_v24  ;;  %v116_v30 = vmul.f32 0.5, %v108_v24 }
  0xe4   :  { %320 = verf.f32 %v119_v25 }
  0xe5   :  { %322 = verf.f32 %v118_v26 }
  0xee   :  { %v321_v27 = vpop.eup %320 }
  0xef   :  { %v323_v28 = vpop.eup %322  ;;  %v123_v29 = vadd.f32 1.0, %v321_v27 }
  0xf0   :  { %v122_v31 = vadd.f32 1.0, %v323_v28 }
  0xf1   :  { %v125_v34 = vmul.f32 %v123_v29, %v117_v32 }
  0xf2   :  { %v124_v33 = vmul.f32 %v122_v31, %v116_v30 }
  0xf4   :  { %290 = vmatprep.mubr.msk.f32.mxu1 %vm141_vm1, %v124_v33 }
  0xf5   :  { %291 = vmatmul.mubr.msk.f32.vlgmr.msra.gmra.mrb[0].mxu1 %vm141_vm1, %v125_v34 }
 0x1c8   :  { %v292_v36 = vpop.f32.mrb[0].mxu1 }
 0x1c9   :  { %v220_v37 = vadd.f32 %v292_v36, %v244_v35  ;;  %v214_v38 = vpop.f32.mrb[1].mxu1 }
 0x1ca   :  { %v215_v39 = vadd.f32 %v244_v35, %v214_v38 }
 0x1cb   :  { %224 = vst.msk [vmem:[#allocation2 + $0x8] sm:$0xff] %vm34_vm0, %v220_v37 }
 0x1cc   :  { %223 = vst.msk [vmem:[#allocation2] sm:$0xff] %vm34_vm0, %v215_v39 }
 0x1cd   :  { %335 = shalt.err (!%p332_p4)
}
 0x1ce   :  { %s336_s25 = scalar_lea.hbm %s450_s5, 256 }
 0x1cf   :  { %p337_p5 = scmp.ne.s32.totalorder %s450_s5, %s336_s25  ;;  %p340_p6 = scmp.lt.u32.totalorder %s336_s25, %s450_s5 }
 0x1d1   :  { %p342_p7 = pnand %p340_p6, %p337_p5 }
 0x1d3   :  { %345 = shalt.err (!%p342_p7)
}
 0x1d4   :  { %s349_s30 = smov 128   ;;  %s350_s1 = smov 8  }
 0x1d5   :  { %236 = dma.vmem_to_hbm [thread:$0]  %s231_s22, 256, %s450_s5, [#allocation3], %s349_s30, %s349_s30, %s350_s1  }
 0x1d6   :  { %346 = dma.done.wait [#allocation3], 256  }
 0x1d7   :  { %347 = vsyncadd [#allocation3], 4294967040 }
 0x1d8   :  { %240 = vsyncpa [#allocation3], 1 }

// kernel: _ffn_impl.1
= control target key start
LH: loop header
LB: loop body
LE: loop exit
PB: predicated region body
PF: predicated region fallthrough
CT: control target
= control target key end

     0   :  { %vm34_vm0 = vcmask 261120   ;;  %s445_s0 = inlined_call_operand.vmem [shape: f32[16,32], index: 0, kind: input, shape index: {}]   ;;  %s446_s1 = inlined_call_operand.vmem [shape: f32[32,64], index: 1, kind: input, shape index: {}]   ;;  %s447_s2 = inlined_call_operand.vmem [shape: f32[1,64], index: 2, kind: input, shape index: {}]   ;;  %s448_s3 = inlined_call_operand.vmem [shape: f32[64,32], index: 3, kind: input, shape index: {}]   ;;  %s449_s4 = inlined_call_operand.vmem [shape: f32[1,32], index: 4, kind: input, shape index: {}]   ;;  %s450_s5 = inlined_call_operand.hbm [shape: f32[16,32], index: 5, kind: output, shape index: {}]  }
   0x1   :  { %v23_v0 = vld [vmem:[%s446_s1] sm:$0xff]  ;;  %v24_v1 = vld [vmem:[%s446_s1 + $0x8] sm:$0xff]  ;;  %v25_v2 = vld [vmem:[%s446_s1 + $0x10] sm:$0xff] }
   0x2   :  { %v293_v3 = vpack.c.bf16 %v24_v1, %v23_v0  ;;  %v26_v4 = vld [vmem:[%s446_s1 + $0x18] sm:$0xff]  ;;  %v21_v5 = vld [vmem:[%s445_s0] sm:$0xff] }
   0x3   :  { %v297_v6 = vpack.c.bf16 %v26_v4, %v25_v2  ;;  %271 = vmatprep.mubr.msk.f32.mxu0 %vm34_vm0, %v21_v5 }
   0x4   :  { %10 = vsyncpa [#allocation3], 0  ;;  %294 = vmatprep.subr.bf16.mxu0 %v293_v3  ;;  %v22_v7 = vld [vmem:[%s445_s0 + $0x8] sm:$0xff]  ;;  %v126_v8 = vld [vmem:[%s448_s3] sm:$0xff]  ;;  %vm141_vm1 = vcmask 523264   ;;  %s348_s21 = smov [#allocation2]  }
   0x5   :  { %296 = vmatpush3.bf16.msra.mxu0 %v293_v3  ;;  %v127_v9 = vld [vmem:[%s448_s3 + $0x8] sm:$0xff]  ;;  %v128_v11 = vld [vmem:[%s448_s3 + $0x10] sm:$0xff]  ;;  %v129_v12 = vld [vmem:[%s448_s3 + $0x18] sm:$0xff]  ;;  %s230_s22 = sshll.u32 %s348_s21, 4  ;;  %s231_s22 = int_to_ptr.vmem [resolvable:$true] %s230_s22 }
   0x6   :  { %298 = vmatprep.subr.bf16.mxu0 %v297_v6  ;;  %v301_v10 = vpack.c.bf16 %v127_v9, %v126_v8  ;;  %v305_v13 = vpack.c.bf16 %v129_v12, %v128_v11  ;;  %v130_v14 = vld [vmem:[%s448_s3 + $0x20] sm:$0xff]  ;;  %v131_v15 = vld [vmem:[%s448_s3 + $0x28] sm:$0xff]  ;;  %v132_v17 = vld [vmem:[%s448_s3 + $0x30] sm:$0xff]  ;;  %s324_s23 = scalar_lea.vmem %s231_s22, 256  ;;  %p329_p1 = scmp.lt.s32.totalorder %s231_s22, %s231_s22 }
   0x7   :  { %v309_v16 = vpack.c.bf16 %v131_v15, %v130_v14  ;;  %v133_v18 = vld [vmem:[%s448_s3 + $0x38] sm:$0xff]  ;;  %v241_v20 = vld [vmem:[%s447_s2] ss:$0 sm:$0xff]  ;;  %p325_p0 = scmp.ne.s32.totalorder %s231_s22, %s324_s23  ;;  %p330_p2 = scmp.lt.s32.totalorder %s324_s23, %s324_s23 }
   0x8   :  { %302 = vmatprep.subr.bf16.mxu1 %v301_v10  ;;  %v313_v19 = vpack.c.bf16 %v133_v18, %v132_v17  ;;  %v244_v35 = vld [vmem:[%s449_s4] ss:$0 sm:$0xff] }
   0x9   :  { %300 = vmatpush3.bf16.msra.mxu0 %v297_v6  ;;  %304 = vmatpush3.bf16.msra.mxu1 %v301_v10  ;;  %p331_p3 = por %p330_p2, %p329_p1 }
   0xa   :  { %306 = vmatprep.subr.bf16.mxu1 %v305_v13 }
   0xb   :  { %p332_p4 = pnand %p331_p3, %p325_p0 }
   0xc   :  { %272 = vmatmul.mubr.msk.f32.vlgmr.msra.gmra.mrb[0].mxu0 %vm34_vm0, %v22_v7 }
   0xd   :  { %308 = vmatpush3.bf16.msra.mxu1 %v305_v13 }
   0xe   :  { %310 = vmatprep.subr.bf16.mxu1 %v309_v16 }
  0x11   :  { %312 = vmatpush3.bf16.msra.mxu1 %v309_v16 }
  0x12   :  { %314 = vmatprep.subr.bf16.mxu1 %v313_v19 }
  0x15   :  { %316 = vmatpush3.bf16.msra.mxu1 %v313_v19 }
  0xdf   :  { %v273_v21 = vpop.f32.mrb[0].mxu0 }
  0xe0   :  { %v113_v22 = vadd.f32 %v273_v21, %v241_v20  ;;  %v107_v23 = vpop.f32.mrb[1].mxu0 }
  0xe1   :  { %v108_v24 = vadd.f32 %v241_v20, %v107_v23 }
  0xe2   :  { %v119_v25 = vmul.f32 0.70710677, %v113_v22  ;;  %v117_v32 = vmul.f32 0.5, %v113_v22 }
  0xe3   :  { %v118_v26 = vmul.f32 0.70710677, %v108_v24  ;;  %v116_v30 = vmul.f32 0.5, %v108_v24 }
  0xe4   :  { %320 = verf.f32 %v119_v25 }
  0xe5   :  { %322 = verf.f32 %v118_v26 }
  0xee   :  { %v321_v27 = vpop.eup %320 }
  0xef   :  { %v323_v28 = vpop.eup %322  ;;  %v123_v29 = vadd.f32 1.0, %v321_v27 }
  0xf0   :  { %v122_v31 = vadd.f32 1.0, %v323_v28 }
  0xf1   :  { %v125_v34 = vmul.f32 %v123_v29, %v117_v32 }
  0xf2   :  { %v124_v33 = vmul.f32 %v122_v31, %v116_v30 }
  0xf4   :  { %290 = vmatprep.mubr.msk.f32.mxu1 %vm141_vm1, %v124_v33 }
  0xf5   :  { %291 = vmatmul.mubr.msk.f32.vlgmr.msra.gmra.mrb[0].mxu1 %vm141_vm1, %v125_v34 }
 0x1c8   :  { %v292_v36 = vpop.f32.mrb[0].mxu1 }
 0x1c9   :  { %v220_v37 = vadd.f32 %v292_v36, %v244_v35  ;;  %v214_v38 = vpop.f32.mrb[1].mxu1 }
 0x1ca   :  { %v215_v39 = vadd.f32 %v244_v35, %v214_v38 }
 0x1cb   :  { %224 = vst.msk [vmem:[#allocation2 + $0x8] sm:$0xff] %vm34_vm0, %v220_v37 }
 0x1cc   :  { %223 = vst.msk [vmem:[#allocation2] sm:$0xff] %vm34_vm0, %v215_v39 }
 0x1cd   :  { %335 = shalt.err (!%p332_p4)
}
 0x1ce   :  { %s336_s25 = scalar_lea.hbm %s450_s5, 256 }
 0x1cf   :  { %p337_p5 = scmp.ne.s32.totalorder %s450_s5, %s336_s25  ;;  %p340_p6 = scmp.lt.u32.totalorder %s336_s25, %s450_s5 }
 0x1d1   :  { %p342_p7 = pnand %p340_p6, %p337_p5 }
 0x1d3   :  { %345 = shalt.err (!%p342_p7)
}
 0x1d4   :  { %s349_s30 = smov 128   ;;  %s350_s1 = smov 8  }
 0x1d5   :  { %236 = dma.vmem_to_hbm [thread:$0]  %s231_s22, 256, %s450_s5, [#allocation3], %s349_s30, %s349_s30, %s350_s1  }
 0x1d6   :  { %346 = dma.done.wait [#allocation3], 256  }
 0x1d7   :  { %347 = vsyncadd [#allocation3], 4294967040 }
 0x1d8   :  { %240 = vsyncpa [#allocation3], 1 }

</bundles_post_ra>
